<compile_context>
chip_gen: v5e
topology: v5e:2x2
jax: 0.10.0
libtpu: 0.0.40
codegen_flags: <defaults>
</compile_context>

<pallas_src>
import math

import jax
import jax.numpy as jnp
from jax import lax
from jax.experimental import pallas as pl
from jax.experimental.pallas import tpu as pltpu

_INV_SQRT2 = 1.0 / math.sqrt(2.0)
H_PAD = 128  # pre_net has 64 units; zero-padded to a full 128-lane register width


def base_model_kernel(x_ref, w_keep_ref, w_ref, b_ref, out_ref):
    # x_ref:      (1, T_TILE, D)   bf16  input features for this (batch, core, seq-tile)
    # w_keep_ref: (1, 1, T_TILE)   f32   (1 - padding_mask) / n_valid, lane-dense over T
    # w_ref:      (D, H_PAD)       bf16  pre_net weight, zero-padded on lanes (resident)
    # b_ref:      (1, H_PAD)       f32   pre_net bias, zero-padded (resident)
    # out_ref:    (1, 1, H_PAD)    f32   pooled output block (resident across the T axis)
    t = pl.program_id(2)

    @pl.when(t == 0)
    def _init():
        out_ref[...] = jnp.zeros_like(out_ref)

    # One bf16 MXU matmul per tile with f32 accumulation: (T_TILE, D) @ (D, H_PAD).
    h = jnp.dot(x_ref[0], w_ref[...], preferred_element_type=jnp.float32)  # (T_TILE, H_PAD) f32
    h = h + b_ref[...]                                    # (1, H_PAD) row broadcast

    # Exact erf GELU (PyTorch nn.GELU(approximate='none')).
    h = 0.5 * h * (1.0 + lax.erf(h * _INV_SQRT2))

    # Masked + normalized pooling as a tiny MXU matmul: (1, T_TILE) @ (T_TILE, H_PAD).
    # The keep weights already carry the exact 1/n_valid factor.
    out_ref[0] += jnp.dot(w_keep_ref[0], h, preferred_element_type=jnp.float32)


def base_model_forward(x, padding_mask, w_pre, b_pre, *, t_tile=None):
    B, T, D = x.shape
    H = w_pre.shape[1]
    assert D % 128 == 0, "feature dim must be lane-aligned"

    if t_tile is None:
        t_tile = T if T <= 2048 else 2048   # amortize per-step overhead; ~3 MiB bf16 per buffer
    assert T % t_tile == 0
    assert t_tile == T or t_tile % 128 == 0, "partial T tiles must be lane-aligned (128)"
    n_t = T // t_tile

    # v7x has 2 TensorCores sharing the grid's parallel axes. If B == 1, split the T tiles
    # over a second parallel axis so both cores get work; partial sums combined below.
    n_core = 2 if (B == 1 and n_t >= 2 and n_t % 2 == 0) else 1
    tpc = n_t // n_core

    # bf16 MXU operands (f32 accumulation inside the kernel).
    x_bf16 = x.astype(jnp.bfloat16)
    w_pad = jnp.zeros((D, H_PAD), jnp.bfloat16).at[:, :H].set(w_pre.astype(jnp.bfloat16))
    b_pad = jnp.zeros((1, H_PAD), jnp.float32).at[:, :H].set(b_pre.astype(jnp.float32))

    # Pre-normalized keep weights, lane-dense over T: (1 - mask) / n_valid, shape (B, 1, T).
    keep = 1.0 - padding_mask.astype(jnp.float32)                 # (B, T)
    inv_den = 1.0 / jnp.sum(keep, axis=1, keepdims=True)          # (B, 1); 0/0 -> NaN on purpose
    w_keep = (keep * inv_den)[:, None, :]                         # (B, 1, T)

    # VMEM budget from actual tile sizes (double-buffered) + f32 intermediate + headroom.
    vmem_limit = int(
        2 * (t_tile * D * 2            # x tile, bf16
             + t_tile * 4              # keep-weight tile, f32
             + D * H_PAD * 2           # weight, bf16 (resident, counted double-buffered)
             + H_PAD * 4               # bias
             + H_PAD * 4)              # output block
        + t_tile * H_PAD * 4           # f32 intermediate h
        + (4 << 20))

    cost = pl.CostEstimate(
        flops=int(2 * B * T * D * H_PAD      # main matmul
                  + 2 * B * T * H_PAD        # pooling matmul
                  + 10 * B * T * H_PAD),     # GELU elementwise
        transcendentals=int(B * T * H_PAD),
        bytes_accessed=int(2 * x_bf16.size + 4 * w_keep.size
                           + 2 * w_pad.size + 4 * b_pad.size     # weights fetched once
                           + 4 * B * n_core * H_PAD),
    )

    out = pl.pallas_call(
        base_model_kernel,
        out_shape=jax.ShapeDtypeStruct((B * n_core, 1, H_PAD), jnp.float32),
        grid_spec=pltpu.PrefetchScalarGridSpec(
            num_scalar_prefetch=0,
            grid=(B, n_core, tpc),
            in_specs=[
                pl.BlockSpec((1, t_tile, D), lambda b, c, t: (b, c * tpc + t, 0)),
                pl.BlockSpec((1, 1, t_tile), lambda b, c, t: (b, 0, c * tpc + t)),
                pl.BlockSpec((D, H_PAD), lambda b, c, t: (0, 0)),
                pl.BlockSpec((1, H_PAD), lambda b, c, t: (0, 0)),
            ],
            out_specs=pl.BlockSpec((1, 1, H_PAD), lambda b, c, t: (b * n_core + c, 0, 0)),
        ),
        compiler_params=pltpu.CompilerParams(
            dimension_semantics=("parallel", "parallel", "arbitrary"),
            vmem_limit_bytes=vmem_limit,
        ),
        cost_estimate=cost,
    )(x_bf16, w_keep, w_pad, b_pad)

    # Combine per-core partial sums (n_core == 1 in the common B >= 2 case) and slice padding.
    out = out.reshape(B, n_core, H_PAD).sum(axis=1)
    return out[:, :H]                                             # (B, 64)


if __name__ == "__main__":
    key = jax.random.PRNGKey(0)
    k_x, k_w1, k_b1, k_w2, k_b2 = jax.random.split(key, 5)

    B, T, D, H, OUT = 2, 8, 768, 64, 4

    # deterministic synthetic parameters (pre_net: Linear(768, 64))
    w_pre = jax.random.normal(k_w1, (D, H), dtype=jnp.float32) * (1.0 / math.sqrt(D))
    b_pre = jax.random.normal(k_b1, (H,), dtype=jnp.float32) * 0.01
    # post_net params exist in __init__ but are unused by forward()
    w_post = jax.random.normal(k_w2, (H, OUT), dtype=jnp.float32) * (1.0 / math.sqrt(H))
    b_post = jax.random.normal(k_b2, (OUT,), dtype=jnp.float32) * 0.01

    # inputs
    x = jax.random.normal(k_x, (B, T, D), dtype=jnp.float32)
    # padding_mask: 1 = padded. Row 0: last 3 padded, row 1: last 1 padded.
    padding_mask = jnp.array(
        [[0, 0, 0, 0, 0, 1, 1, 1],
         [0, 0, 0, 0, 0, 0, 0, 1]], dtype=jnp.int32
    )

    out = base_model_forward(x, padding_mask, w_pre, b_pre)
    out = jax.block_until_ready(out)

    # pure-JAX f32 reference (kernel runs the matmul in bf16 -> loosened tolerance)
    h_ref = x @ w_pre + b_pre
    h_ref = 0.5 * h_ref * (1.0 + lax.erf(h_ref / math.sqrt(2.0)))
    keep = 1.0 - padding_mask.astype(jnp.float32)
    ref = (h_ref * keep[..., None]).sum(axis=1) / keep.sum(axis=1, keepdims=True)

    assert out.shape == (B, H)
    max_err = float(jnp.max(jnp.abs(out - ref)))
    assert jnp.allclose(out, ref, atol=3e-2, rtol=3e-2), max_err

    print("KERNEL_OK")
</pallas_src>

<mosaic_0001>
module attributes {stable_mosaic.version = 11 : i64} {
  func.func @base_model_kernel(%arg0: i32, %arg1: i32, %arg2: i32, %arg3: memref<1x8x768xbf16, #tpu.memory_space<vmem>>, %arg4: memref<1x1x8xf32, #tpu.memory_space<vmem>>, %arg5: memref<768x128xbf16, #tpu.memory_space<vmem>>, %arg6: memref<1x128xf32, #tpu.memory_space<vmem>>, %arg7: memref<1x1x128xf32, #tpu.memory_space<vmem>>) attributes {dimension_semantics = [#tpu.dimension_semantics<parallel>, #tpu.dimension_semantics<parallel>, #tpu.dimension_semantics<arbitrary>], iteration_bounds = array<i64: 2, 1, 1>, scalar_prefetch = 0 : i64, scratch_operands = 0 : i64, tpu.core_type = #tpu.core_type<tc>, window_params = [{transform_indices = @transform_0, window_bounds = array<i64: 1, 8, 768>}, {transform_indices = @transform_1, window_bounds = array<i64: 1, 1, 8>}, {pipeline_mode = #tpu.pipeline_mode<synchronous>, transform_indices = @transform_2, window_bounds = array<i64: 768, 128>}, {pipeline_mode = #tpu.pipeline_mode<synchronous>, transform_indices = @transform_3, window_bounds = array<i64: 1, 128>}, {transform_indices = @transform_4, window_bounds = array<i64: 1, 1, 128>}]} {
    %c0_i32 = arith.constant 0 : i32
    %0 = arith.cmpi eq, %arg2, %c0_i32 : i32
    %1 = arith.extui %0 : i1 to i32
    %c0_i32_0 = arith.constant 0 : i32
    %2 = arith.cmpi ne, %1, %c0_i32_0 : i32
    scf.if %2 {
      %cst_20 = arith.constant 0.000000e+00 : f32
      %27 = vector.broadcast %cst_20 : f32 to vector<1x1x128xf32>
      %c0_21 = arith.constant 0 : index
      %c0_22 = arith.constant 0 : index
      %c0_23 = arith.constant 0 : index
      %28 = vector.load %arg7[%c0_21, %c0_22, %c0_23] : memref<1x1x128xf32, #tpu.memory_space<vmem>>, vector<1x1x128xf32>
      tpu.vector_store %arg7[%c0_21, %c0_22, %c0_23], %27 {strides = array<i32>} : memref<1x1x128xf32, #tpu.memory_space<vmem>>, vector<1x1x128xf32>,
    } else {
    }
    %c0 = arith.constant 0 : index
    %c0_1 = arith.constant 0 : index
    %c0_2 = arith.constant 0 : index
    %3 = vector.load %arg3[%c0, %c0_1, %c0_2] : memref<1x8x768xbf16, #tpu.memory_space<vmem>>, vector<1x8x768xbf16>
    %4 = vector.shape_cast %3 : vector<1x8x768xbf16> to vector<8x768xbf16>
    %c0_3 = arith.constant 0 : index
    %c0_4 = arith.constant 0 : index
    %5 = vector.load %arg5[%c0_3, %c0_4] : memref<768x128xbf16, #tpu.memory_space<vmem>>, vector<768x128xbf16>
    %cst = arith.constant dense<0.000000e+00> : vector<8x128xf32>
    %6 = tpu.matmul %4, %5, %cst {dimension_numbers = #tpu.dot_dimension_numbers<[1], [0], [0], [1], [0, 0, 1, 1], [], []>} : vector<8x768xbf16>, vector<768x128xbf16>, vector<8x128xf32> -> vector<8x128xf32>
    %c0_5 = arith.constant 0 : index
    %c0_6 = arith.constant 0 : index
    %7 = vector.load %arg6[%c0_5, %c0_6] : memref<1x128xf32, #tpu.memory_space<vmem>>, vector<1x128xf32>
    %8 = vector.broadcast %7 : vector<1x128xf32> to vector<8x128xf32>
    %9 = arith.addf %6, %8 : vector<8x128xf32>
    %cst_7 = arith.constant 5.000000e-01 : f32
    %10 = vector.broadcast %cst_7 : f32 to vector<8x128xf32>
    %11 = arith.mulf %10, %9 : vector<8x128xf32>
    %cst_8 = arith.constant 0.707106769 : f32
    %12 = vector.broadcast %cst_8 : f32 to vector<8x128xf32>
    %13 = arith.mulf %9, %12 : vector<8x128xf32>
    %14 = math.erf %13 : vector<8x128xf32>
    %cst_9 = arith.constant 1.000000e+00 : f32
    %15 = vector.broadcast %cst_9 : f32 to vector<8x128xf32>
    %16 = arith.addf %15, %14 : vector<8x128xf32>
    %17 = arith.mulf %11, %16 : vector<8x128xf32>
    %c0_10 = arith.constant 0 : index
    %c0_11 = arith.constant 0 : index
    %c0_12 = arith.constant 0 : index
    %18 = vector.load %arg7[%c0_10, %c0_11, %c0_12] : memref<1x1x128xf32, #tpu.memory_space<vmem>>, vector<1x1x128xf32>
    %19 = vector.shape_cast %18 : vector<1x1x128xf32> to vector<1x128xf32>
    %c0_13 = arith.constant 0 : index
    %c0_14 = arith.constant 0 : index
    %c0_15 = arith.constant 0 : index
    %20 = vector.load %arg4[%c0_13, %c0_14, %c0_15] : memref<1x1x8xf32, #tpu.memory_space<vmem>>, vector<1x1x8xf32>
    %21 = vector.shape_cast %20 : vector<1x1x8xf32> to vector<1x8xf32>
    %cst_16 = arith.constant dense<0.000000e+00> : vector<1x128xf32>
    %22 = tpu.matmul %21, %17, %cst_16 {dimension_numbers = #tpu.dot_dimension_numbers<[1], [0], [0], [1], [0, 0, 1, 1], [], []>} : vector<1x8xf32>, vector<8x128xf32>, vector<1x128xf32> -> vector<1x128xf32>
    %23 = arith.addf %19, %22 : vector<1x128xf32>
    %c0_17 = arith.constant 0 : index
    %c0_18 = arith.constant 0 : index
    %c0_19 = arith.constant 0 : index
    %24 = vector.load %arg7[%c0_17, %c0_18, %c0_19] : memref<1x1x128xf32, #tpu.memory_space<vmem>>, vector<1x1x128xf32>
    %25 = vector.shape_cast %24 : vector<1x1x128xf32> to vector<1x128xf32>
    %26 = vector.shape_cast %23 : vector<1x128xf32> to vector<1x1x128xf32>
    tpu.vector_store %arg7[%c0_17, %c0_18, %c0_19], %26 {strides = array<i32>} : memref<1x1x128xf32, #tpu.memory_space<vmem>>, vector<1x1x128xf32>,
    return
  }
  func.func @transform_0(%arg0: i32, %arg1: i32, %arg2: i32) -> (i32, i32, i32) {
    %c1_i32 = arith.constant 1 : i32
    %0 = arith.muli %arg1, %c1_i32 : i32
    %1 = arith.addi %0, %arg2 : i32
    %c0_i32 = arith.constant 0 : i32
    %c0_i32_0 = arith.constant 0 : i32
    return %arg0, %1, %c0_i32 : i32, i32, i32
  }
  func.func @transform_1(%arg0: i32, %arg1: i32, %arg2: i32) -> (i32, i32, i32) {
    %c1_i32 = arith.constant 1 : i32
    %0 = arith.muli %arg1, %c1_i32 : i32
    %1 = arith.addi %0, %arg2 : i32
    %c0_i32 = arith.constant 0 : i32
    %c0_i32_0 = arith.constant 0 : i32
    return %arg0, %c0_i32, %1 : i32, i32, i32
  }
  func.func @transform_2(%arg0: i32, %arg1: i32, %arg2: i32) -> (i32, i32) {
    %c0_i32 = arith.constant 0 : i32
    %c0_i32_0 = arith.constant 0 : i32
    %c0_i32_1 = arith.constant 0 : i32
    return %c0_i32, %c0_i32_0 : i32, i32
  }
  func.func @transform_3(%arg0: i32, %arg1: i32, %arg2: i32) -> (i32, i32) {
    %c0_i32 = arith.constant 0 : i32
    %c0_i32_0 = arith.constant 0 : i32
    %c0_i32_1 = arith.constant 0 : i32
    return %c0_i32, %c0_i32_0 : i32, i32
  }
  func.func @transform_4(%arg0: i32, %arg1: i32, %arg2: i32) -> (i32, i32, i32) {
    %c1_i32 = arith.constant 1 : i32
    %0 = arith.muli %arg0, %c1_i32 : i32
    %1 = arith.addi %0, %arg1 : i32
    %c0_i32 = arith.constant 0 : i32
    %c0_i32_0 = arith.constant 0 : i32
    %c0_i32_1 = arith.constant 0 : i32
    return %1, %c0_i32, %c0_i32_0 : i32, i32, i32
  }
}

</mosaic_0001>

<bundles_post_ra>
// kernel: tpu_custom_call.1
= control target key start
LH: loop header
LB: loop body
LE: loop exit
PB: predicated region body
PF: predicated region fallthrough
CT: control target
= control target key end

     0   :  { %s1725_s0 = inlined_call_operand.hbm [shape: bf16[2,8,768], index: 0, kind: input, shape index: {}]   ;;  %s1726_s1 = inlined_call_operand.hbm [shape: f32[2,1,8], index: 1, kind: input, shape index: {}]   ;;  %s1727_s2 = inlined_call_operand.hbm [shape: bf16[768,128], index: 2, kind: input, shape index: {}]   ;;  %s1728_s3 = inlined_call_operand.vmem [shape: f32[1,128], index: 3, kind: input, shape index: {}]   ;;  %s1729_s4 = inlined_call_operand.hbm [shape: f32[2,1,128], index: 4, kind: output, shape index: {}]  }
   0x1   :  { %1734 = sst [smem:[#allocation17_spill]] %s1727_s2 }
   0x2   :  { %9 = vsyncpa [#allocation3], 0 }
   0x3   :  { %11 = vsyncpa [#allocation3 + $0x1], 0 }
   0x4   :  { %12 = vsyncpa [#allocation6], 0 }
   0x5   :  { %14 = vsyncpa [#allocation6 + $0x1], 0 }
   0x6   :  { %15 = vsyncpa [#allocation4], 0 }
   0x7   :  { %17 = vsyncpa [#allocation4 + $0x1], 0  ;;  %s1546_s15 = smov 0   ;;  %s1548_s16 = smov 0  }
   0x8   :  { %s1550_s17 = smov 0   ;;  %s1552_s18 = smov 0  }
   0x9   :  { %s1554_s19 = smov 0   ;;  %s1556_s20 = smov 0  }
   0xa LB: > { %1735 = sst [smem:[#allocation13_spill]] %s1503_s17  ;;  %s1577_s21 = sadd.s32 4294967295, %s1515_s20   ;;  %s1515_s20 = sphi %s1556_s20, %s23_s20   ;;  %s1511_s19 = sphi %s1554_s19, %s1754_s19   ;;  %s1507_s18 = sphi %s1552_s18, %s1753_s18   ;;  %s1503_s17 = sphi %s1550_s17, %s1752_s17   ;;  %s1499_s16 = sphi %s1548_s16, %s1751_s16   ;;  %s1495_s15 = sphi %s1546_s15, %s1750_s15  }
   0xb   : > { %1736 = sst [smem:[#allocation14_spill]] %s1515_s20  ;;  %p998_p0 = scmp.ge.s32.totalorder %s1515_s20, 1 }
   0xc   : > { %p67_p1 = scmp.eq.s32.totalorder %s1577_s21, 0  ;;  %p177_p2 = scmp.lt.s32.totalorder %s1515_s20, 3 }
   0xd   : > { %s1737_s2 = sld [smem:[#allocation17_spill]]  ;;  %s1517_s26 = smov [#allocation7]  }
   0xe   : > { %p1585_p3 = pnand %p998_p0, %p177_p2  ;;  %s190_s27 = sshll.u32 %s1517_s26, 4  ;;  %s191_s27 = int_to_ptr.vmem [resolvable:$true] %s190_s27 }
   0xf   : > { %p1000_p6 = scmp.ge.s32.totalorder %s1515_s20, 2  ;;  %s1518_s28 = smov 64  }
  0x10   : > { %p1261_p4 = pneg %p1585_p3  ;;  %s1519_s29 = smov 4  }
  0x11   : > { %s997_s30 = sadd.s32 4294967294, %s1515_s20   ;;  %s42_s5 = sadd.s32 1, %s1511_s19 }
  0x12   : > { %p1262_p5 = pnand %p1261_p4, %p67_p1  ;;  %s53_s6 = sadd.s32 1, %s1503_s17 }
  0x13   : > { %s188_s24 = sshll.u32 %s1737_s2, 4  ;;  %p44_p7 = scmp.ge.s32.totalorder %s42_s5, 2  ;;  %s189_s24 = int_to_ptr.hbm [resolvable:$true] %s188_s24 }
  0x14   : > { %1264 = dma.hbm_to_vmem [thread:$0]  (!%p1262_p5), %s189_s24, 6144, %s191_s27, [#allocation6], %s1518_s28, %s1518_s28, %s1519_s29  }
  0x15   : > { %p60_p8 = scmp.ne.s32.totalorder %s1503_s17, %s1499_s16  ;;  %p61_p9 = scmp.eq.s32.totalorder %s1515_s20, 0 }
  0x16   : > { %p66_p10 = scmp.ne.s32.totalorder %s1499_s16, %s1495_s15  ;;  %s1756_s5 = smov (%p44_p7, %s42_s5), 0 }
  0x17   : > { %1739 = sst [smem:[#allocation15_spill]] %s1756_s5  ;;  %p1604_p11 = por %p61_p9, %p60_p8 }
  0x18   : > { %p1610_p12 = por %p67_p1, %p66_p10  ;;  %s48_s9 = ssub.s32 %s1511_s19, %s1756_s5 }
  0x19   : > { %p164_p13 = scmp.eq.s32.totalorder %s1577_s21, 1  ;;  %p51_p0 = scmp.eq.s32.totalorder %s48_s9, 0 }
  0x1a   : > { %p170_p2 = scmp.eq.s32.totalorder %s997_s30, 1  ;;  %p1277_p5 = scmp.lt.s32.totalorder %s1515_s20, 2 }
  0x1b   : > { %p1617_p4 = por %p164_p13, %p60_p8  ;;  %s207_s13 = sand.u32 1, %s1503_s17  }
  0x1c   : > { %s1623_s11 = scalar_select %p51_p0, %s1503_s17, %s53_s6  }
  0x1d   : > { %p1625_p7 = por %p170_p2, %p66_p10  ;;  %s1248_s14 = smul.u32 24, %s207_s13 }
  0x1e   : > { %1743 = sst [smem:[#allocation16_spill]] %s1623_s11  ;;  %s1249_s22 = smul.u32 24, %s1511_s19 }
  0x1f   : > { %p1633_p9 = pnand %p1277_p5, %p1604_p11  ;;  %s230_s24 = sand.u32 1, %s1515_s20  }
  0x20   : > { %s219_s28 = scalar_lea.hbm %s1725_s0, %s1249_s22  ;;  %s211_s29 = scalar_lea.vmem [#allocation2], %s1248_s14 }
  0x21   : > { %s223_s30 = sshll.u32 %s211_s29, 4  ;;  %s221_s6 = sshll.u32 %s219_s28, 4  ;;  %s224_s30 = int_to_ptr.vmem [resolvable:$true] %s223_s30  ;;  %s222_s6 = int_to_ptr.hbm [resolvable:$true] %s221_s6 }
  0x22   : > { %s208_s9 = scalar_lea.sflag [#allocation3], %s207_s13  ;;  %s238_s5 = scalar_lea.hbm %s1726_s1, %s1511_s19 }
  0x23   : > { %1268 = dma.hbm_to_vmem [thread:$0]  (!%p1633_p9), %s222_s6, 384, %s224_s30, %s208_s9  }
  0x24   : > { %s233_s11 = scalar_lea.vmem [#allocation5], %s207_s13  ;;  %s240_s20 = sshll.u32 %s238_s5, 4  ;;  %s241_s20 = int_to_ptr.hbm [resolvable:$true] %s240_s20 }
  0x25   : > { %s242_s17 = sshll.u32 %s233_s11, 4  ;;  %s231_s26 = scalar_lea.sflag [#allocation6], %s230_s24  ;;  %s243_s17 = int_to_ptr.vmem [resolvable:$true] %s242_s17 }
  0x26   : > { %1271 = dma.hbm_to_vmem [thread:$0]  (!%p1633_p9), %s241_s20, 16, %s243_s17, %s231_s26  }
  0x27   : > { %251 = sbr.rel (%p1585_p3) target bundleno = 433 (0x1b1), region = 36  ;;  %s1652_s14 = sand.u32 (!%p1585_p3), 1, %s1499_s16  }
  0x28   : > { %s1250_s22 = smul.u32 (!%p1585_p3), 24, %s1652_s14  ;;  %s254_s2 = scalar_lea.sflag (!%p1585_p3), [#allocation3], %s1652_s14 }
  0x2a   : > { %s1656_s27 = scalar_lea.vmem (!%p1585_p3), [#allocation2], %s1250_s22 }
  0x2c   : > { %1478 = dma.done.wait (%p1610_p12), %s254_s2, 384  }
  0x2d   : > { %1480 = vsyncadd (%p1610_p12), %s254_s2, 4294966912  ;;  %s263_s17 = sand.u32 1, %s1577_s21   ;;  %s266_s25 = scalar_lea.vmem [#allocation5], %s1652_s14 }
  0x2e   : > { %s264_s20 = scalar_lea.sflag [#allocation6], %s263_s17 }
  0x2f   : > { %1482 = dma.done.wait (%p1610_p12), %s264_s20, 16  }
  0x30   : > { %1484 = vsyncadd (%p1610_p12), %s264_s20, 4294967280 }
  0x31   : > { %1486 = dma.done.wait (%p67_p1), [#allocation6], 6144  }
  0x32   : > { %1488 = vsyncadd (%p67_p1), [#allocation6], 4294961152  ;;  %v1207_v0 = vld [vmem:[#allocation7 + $0x38] sm:$0xff]  ;;  %v1206_v2 = vld [vmem:[#allocation7 + $0x30] sm:$0xff]  ;;  %s1679_s8 = scalar_lea.vmem [#allocation8], %s1652_s14  ;;  %vm844_vm4 = vcmask 64512   ;;  %s880_s23 = scalar_lea.hbm %s1729_s4, %s1507_s18 }
  0x33   : > { %v1215_v1 = vld [vmem:[#allocation7 + $0x78] sm:$0xff]  ;;  %720 = vmatpush.bf16.msra.mxu0 %v1207_v0  ;;  %v1214_v3 = vld [vmem:[#allocation7 + $0x70] sm:$0xff]  ;;  %v1205_v8 = vld [vmem:[#allocation7 + $0x28] sm:$0xff]  ;;  %s882_s24 = sshll.u32 %s1679_s8, 4  ;;  %s884_s28 = sshll.u32 %s880_s23, 4  ;;  %s883_s24 = int_to_ptr.vmem [resolvable:$true] %s882_s24  ;;  %s885_s28 = int_to_ptr.hbm [resolvable:$true] %s884_s28 }
  0x34   : > { %733 = vmatpush.bf16.msra.mxu1 %v1215_v1  ;;  %v1223_v4 = vld [vmem:[#allocation7 + $0xb8] sm:$0xff]  ;;  %v1222_v6 = vld [vmem:[#allocation7 + $0xb0] sm:$0xff]  ;;  %v1213_v9 = vld [vmem:[#allocation7 + $0x68] sm:$0xff]  ;;  %s871_s29 = scalar_lea.sflag [#allocation4], %s1652_s14  ;;  %s1439_s30 = sshra.s32 %s885_s28, 4  ;;  %s1440_s30 = int_to_ptr.hbm [resolvable:$true] %s1439_s30 }
  0x35   : > { %v1231_v5 = vld [vmem:[#allocation7 + $0xf8] sm:$0xff]  ;;  %746 = vmatpush.bf16.msra.mxu2 %v1223_v4  ;;  %v1230_v7 = vld [vmem:[#allocation7 + $0xf0] sm:$0xff]  ;;  %v1221_v10 = vld [vmem:[#allocation7 + $0xa8] sm:$0xff]  ;;  %s1441_s6 = scalar_lea.hbm %s1440_s30, 1  ;;  %s1445_s18 = scalar_lea.hbm %s1729_s4, 2 }
  0x36   : > { %759 = vmatpush.bf16.msra.mxu3 %v1231_v5  ;;  %v1229_v11 = vld [vmem:[#allocation7 + $0xe8] sm:$0xff]  ;;  %v1204_v12 = vld [vmem:[#allocation7 + $0x20] sm:$0xff]  ;;  %v1203_v16 = vld [vmem:[#allocation7 + $0x18] sm:$0xff]  ;;  %p1442_p1 = scmp.ne.s32.totalorder %s1440_s30, %s1441_s6  ;;  %p1446_p10 = scmp.lt.s32.totalorder %s1440_s30, %s1729_s4 }
  0x37   : > { %721 = vmatpush.bf16.msra.mxu0 %v1206_v2  ;;  %v1212_v13 = vld [vmem:[#allocation7 + $0x60] sm:$0xff]  ;;  %v1211_v17 = vld [vmem:[#allocation7 + $0x58] sm:$0xff]  ;;  %v1202_v20 = vld [vmem:[#allocation7 + $0x10] sm:$0xff]  ;;  %p1447_p11 = scmp.lt.s32.totalorder %s1445_s18, %s1441_s6 }
  0x38   : > { %734 = vmatpush.bf16.msra.mxu1 %v1214_v3  ;;  %v1220_v14 = vld [vmem:[#allocation7 + $0xa0] sm:$0xff]  ;;  %v1219_v18 = vld [vmem:[#allocation7 + $0x98] sm:$0xff]  ;;  %v1210_v21 = vld [vmem:[#allocation7 + $0x50] sm:$0xff]  ;;  %p1443_p3 = pnand %p1442_p1, %p1617_p4 }
  0x39   : > { %747 = vmatpush.bf16.msra.mxu2 %v1222_v6  ;;  %v1228_v15 = vld [vmem:[#allocation7 + $0xe0] sm:$0xff]  ;;  %v1227_v19 = vld [vmem:[#allocation7 + $0xd8] sm:$0xff]  ;;  %v1218_v22 = vld [vmem:[#allocation7 + $0x90] sm:$0xff]  ;;  %p1448_p12 = por %p1447_p11, %p1446_p10 }
  0x3a   : > { %760 = vmatpush.bf16.msra.mxu3 %v1230_v7  ;;  %v1226_v23 = vld [vmem:[#allocation7 + $0xd0] sm:$0xff]  ;;  %v1201_v24 = vld [vmem:[#allocation7 + $0x8] sm:$0xff]  ;;  %v1200_v32 = vld [vmem:[#allocation7] sm:$0xff]  ;;  %p1444_p8 = pneg %p1443_p3 }
  0x3b   : > { %722 = vmatpush.bf16.msra.mxu0 %v1205_v8  ;;  %v1209_v25 = vld [vmem:[#allocation7 + $0x48] sm:$0xff]  ;;  %v1208_v33 = vld [vmem:[#allocation7 + $0x40] sm:$0xff]  ;;  %v1239_v34 = vld [vmem:[#allocation7 + $0x138] sm:$0xff] }
  0x3c   : > { %735 = vmatpush.bf16.msra.mxu1 %v1213_v9  ;;  %v308_v26 = vld [vmem:[%s1656_s27] sm:$0xff]  ;;  %v309_v31 = vld [vmem:[%s1656_s27 + $0x8] sm:$0xff]  ;;  %v310_v56 = vld [vmem:[%s1656_s27 + $0x10] sm:$0xff]  ;;  %p1449_p13 = pnand %p1448_p12, %p1444_p8 }
  0x3d   : > { %748 = vmatpush.bf16.msra.mxu2 %v1221_v10  ;;  %v1217_v27 = vld [vmem:[#allocation7 + $0x88] sm:$0xff]  ;;  %v414_v28 = vunpack.c.l.b16 %v308_v26  ;;  %v415_v30 = vunpack.c.h.b16 %v308_v26  ;;  %v1247_v35 = vld [vmem:[#allocation7 + $0x178] sm:$0xff]  ;;  %v1216_v36 = vld [vmem:[#allocation7 + $0x80] sm:$0xff]  ;;  %v416_v37 = vunpack.c.l.b16 %v309_v31  ;;  %v417_v40 = vunpack.c.h.b16 %v309_v31 }
  0x3e   : > { %761 = vmatpush.bf16.msra.mxu3 %v1229_v11  ;;  %v1225_v29 = vld [vmem:[#allocation7 + $0xc8] sm:$0xff]  ;;  %v1224_v41 = vld [vmem:[#allocation7 + $0xc0] sm:$0xff]  ;;  %v1238_v42 = vld [vmem:[#allocation7 + $0x130] sm:$0xff]  ;;  %v418_v57 = vunpack.c.l.b16 %v310_v56  ;;  %v419_v58 = vunpack.c.h.b16 %v310_v56 }
  0x3f   : > { %723 = vmatpush.bf16.msra.mxu0 %v1204_v12  ;;  %v420_v38 = vpack.c.b16 %v414_v28, %v414_v28  ;;  %v421_v39 = vpack.c.b16 %v415_v30, %v415_v30  ;;  %v1246_v43 = vld [vmem:[#allocation7 + $0x170] sm:$0xff]  ;;  %v422_v44 = vpack.c.b16 %v416_v37, %v416_v37  ;;  %v423_v45 = vpack.c.b16 %v417_v40, %v417_v40  ;;  %v1237_v46 = vld [vmem:[#allocation7 + $0x128] sm:$0xff]  ;;  %v1236_v48 = vld [vmem:[#allocation7 + $0x120] sm:$0xff] }
  0x40   : > { %736 = vmatpush.bf16.msra.mxu1 %v1212_v13  ;;  %v1245_v47 = vld [vmem:[#allocation7 + $0x168] sm:$0xff]  ;;  %v1244_v49 = vld [vmem:[#allocation7 + $0x160] sm:$0xff]  ;;  %v1235_v50 = vld [vmem:[#allocation7 + $0x118] sm:$0xff]  ;;  %v424_v61 = vpack.c.b16 %v418_v57, %v418_v57  ;;  %v425_v62 = vpack.c.b16 %v419_v58, %v419_v58 }
  0x41   : > { %749 = vmatpush.bf16.msra.mxu2 %v1220_v14  ;;  %v1243_v51 = vld [vmem:[#allocation7 + $0x158] sm:$0xff]  ;;  %v1234_v52 = vld [vmem:[#allocation7 + $0x110] sm:$0xff]  ;;  %v1233_v54 = vld [vmem:[#allocation7 + $0x108] sm:$0xff] }
  0x42   : > { %762 = vmatpush.bf16.msra.mxu3 %v1228_v15  ;;  %v1242_v53 = vld [vmem:[#allocation7 + $0x150] sm:$0xff]  ;;  %v1241_v55 = vld [vmem:[#allocation7 + $0x148] sm:$0xff]  ;;  %v1232_v59 = vld [vmem:[#allocation7 + $0x100] sm:$0xff] }
  0x43   : > { %724 = vmatpush.bf16.msra.mxu0 %v1203_v16  ;;  %v1240_v60 = vld [vmem:[#allocation7 + $0x140] sm:$0xff]  ;;  %v1332_v5 = vld [vmem:[%s1728_s3] ss:$0 sm:$0xff] }
  0x44   : > { %737 = vmatpush.bf16.msra.mxu1 %v1211_v17  ;;  %v843_v58 = vld [vmem:[%s266_s25] sm:$0x1] }
  0x45   : > { %750 = vmatpush.bf16.msra.mxu2 %v1219_v18 }
  0x46   : > { %763 = vmatpush.bf16.msra.mxu3 %v1227_v19 }
  0x47   : > { %725 = vmatpush.bf16.msra.mxu0 %v1202_v20 }
  0x48   : > { %738 = vmatpush.bf16.msra.mxu1 %v1210_v21 }
  0x49   : > { %751 = vmatpush.bf16.msra.mxu2 %v1218_v22 }
  0x4a   : > { %764 = vmatpush.bf16.msra.mxu3 %v1226_v23 }
  0x4b   : > { %726 = vmatpush.bf16.msra.mxu0 %v1201_v24 }
  0x4c   : > { %739 = vmatpush.bf16.msra.mxu1 %v1209_v25 }
  0x4d   : > { %752 = vmatpush.bf16.msra.mxu2 %v1217_v27 }
  0x4e   : > { %765 = vmatpush.bf16.msra.mxu3 %v1225_v29 }
  0x4f   : > { %727 = vmatpush.bf16.msra.mxu0 %v1200_v32 }
  0x50   : > { %740 = vmatpush.bf16.msra.mxu1 %v1208_v33 }
  0x51   : > { %753 = vmatpush.bf16.msra.mxu2 %v1216_v36 }
  0x52   : > { %728 = vmatmul.bf16.vlgmr.msra.gmra.mxu0 %v420_v38  ;;  %766 = vmatpush.bf16.msra.mxu3 %v1224_v41 }
  0x53   : > { %772 = vmatpush.bf16.msrb.mxu0 %v1239_v34  ;;  %741 = vmatmul.bf16.vlgmr.msra.gmra.mxu1 %v421_v39 }
  0x54   : > { %785 = vmatpush.bf16.msrb.mxu1 %v1247_v35  ;;  %754 = vmatmul.bf16.vlgmr.msra.gmra.mxu2 %v422_v44  ;;  %v1520_v35 = vmov 0.0  }
  0x55   : > { %767 = vmatmul.bf16.vlgmr.msra.gmra.mxu3 %v423_v45  ;;  %307 = vst [vmem:[%s1679_s8] sm:$0x1] %v1520_v35 }
  0x57   : > { %773 = vmatpush.bf16.msrb.mxu0 %v1238_v42 }
  0x58   : > { %786 = vmatpush.bf16.msrb.mxu1 %v1246_v43 }
  0x5b   : > { %774 = vmatpush.bf16.msrb.mxu0 %v1237_v46 }
  0x5c   : > { %787 = vmatpush.bf16.msrb.mxu1 %v1245_v47 }
  0x5f   : > { %775 = vmatpush.bf16.msrb.mxu0 %v1236_v48 }
  0x60   : > { %788 = vmatpush.bf16.msrb.mxu1 %v1244_v49 }
  0x63   : > { %776 = vmatpush.bf16.msrb.mxu0 %v1235_v50 }
  0x64   : > { %789 = vmatpush.bf16.msrb.mxu1 %v1243_v51 }
  0x67   : > { %777 = vmatpush.bf16.msrb.mxu0 %v1234_v52 }
  0x68   : > { %790 = vmatpush.bf16.msrb.mxu1 %v1242_v53 }
  0x6b   : > { %778 = vmatpush.bf16.msrb.mxu0 %v1233_v54 }
  0x6c   : > { %791 = vmatpush.bf16.msrb.mxu1 %v1241_v55 }
  0x6f   : > { %779 = vmatpush.bf16.msrb.mxu0 %v1232_v59  ;;  %v842_v59 = vld [vmem:[%s1679_s8] sm:$0x1] }
  0x70   : > { %792 = vmatpush.bf16.msrb.mxu1 %v1240_v60 }
  0x72   : > { %780 = vmatmul.bf16.vlgmr.msrb.gmra.mxu0 %v424_v61 }
  0x73   : > { %793 = vmatmul.bf16.vlgmr.msrb.gmra.mxu1 %v425_v62 }
  0xcf   : > { %v729_v63 = vpop.f32.mrf.mxu0 }
  0xd0   : > { %v742_v0 = vpop.f32.mrf.mxu1  ;;  %v730_v6 = vadd.f32 %v1332_v5, %v729_v63 }
  0xd2   : > { %v743_v9 = vadd.f32 %v742_v0, %v730_v6 }
  0xd7   : > { %v731_v1 = vpop.f32.mrf.mxu0  ;;  %v755_v3 = vpop.f32.mrf.mxu2 }
  0xd8   : > { %v744_v2 = vpop.f32.mrf.mxu1  ;;  %v768_v4 = vpop.f32.mrf.mxu3  ;;  %v756_v10 = vadd.f32 %v755_v3, %v743_v9 }
  0xda   : > { %v769_v11 = vadd.f32 %v768_v4, %v756_v10 }
  0xdf   : > { %v757_v7 = vpop.f32.mrf.mxu2 }
  0xe0   : > { %v770_v8 = vpop.f32.mrf.mxu3 }
  0xef   : > { %v781_v12 = vpop.f32.mrf.mxu0 }
  0xf0   : > { %v794_v13 = vpop.f32.mrf.mxu1  ;;  %v782_v14 = vadd.f32 %v781_v12, %v769_v11 }
  0xf2   : > { %v795_v15 = vadd.f32 %v794_v13, %v782_v14 }
  0xf4   : > { %v799_v16 = vmul.f32 0.70710677, %v795_v15  ;;  %v798_v55 = vmul.f32 0.5, %v795_v15 }
  0xf6   : > { %v800_v17 = vmul.f32 %v799_v16, %v799_v16 }
  0xf7   : > { %v783_v18 = vpop.f32.mrf.mxu0 }
  0xf8   : > { %v796_v19 = vpop.f32.mrf.mxu1  ;;  %v801_v20 = vmin.f32 %v800_v17, 16.0 }
  0xfa   : > { %v802_v21 = vmul.f32 2.1237322e-06, %v801_v20  ;;  %v813_v22 = vmul.f32 3.8918573e-05, %v801_v20 }
  0xfc   : > { %v803_v23 = vadd.f32 0.00028619796, %v802_v21  ;;  %v814_v24 = vadd.f32 0.001143296, %v813_v22 }
  0xfe   : > { %v804_v25 = vmul.f32 %v803_v23, %v801_v20  ;;  %v815_v26 = vmul.f32 %v814_v24, %v801_v20 }
 0x100   : > { %v816_v27 = vadd.f32 0.014752088, %v815_v26  ;;  %v805_v28 = vadd.f32 0.0036580483, %v804_v25 }
 0x102   : > { %v817_v29 = vmul.f32 %v816_v27, %v801_v20  ;;  %v806_v31 = vmul.f32 %v805_v28, %v801_v20 }
 0x104   : > { %v818_v30 = vadd.f32 0.112945676, %v817_v29  ;;  %v807_v34 = vadd.f32 0.05243302, %v806_v31 }
 0x106   : > { %v819_v32 = vmul.f32 %v818_v30, %v801_v20  ;;  %v808_v38 = vmul.f32 %v807_v34, %v801_v20 }
 0x108   : > { %v820_v33 = vadd.f32 0.4994258, %v819_v32  ;;  %v809_v39 = vadd.f32 0.18741608, %v808_v38 }
 0x10a   : > { %v821_v36 = vmul.f32 %v820_v33, %v801_v20  ;;  %v810_v41 = vmul.f32 %v809_v39, %v801_v20 }
 0x10c   : > { %v822_v37 = vadd.f32 1.0, %v821_v36  ;;  %v811_v45 = vadd.f32 1.1283791, %v810_v41 }
 0x10e   : > { %1333 = vrcp.f32 %v822_v37  ;;  %v834_v44 = vand.u32 2147483648, %v822_v37  ;;  %v832_v47 = vand.u32 2147483647, %v822_v37  ;;  %vm828_vm1 = vweird.f32 %v822_v37 }
 0x10f   : > { %v812_v50 = vmul.f32 %v811_v45, %v799_v16 }
 0x110   : > { %v835_v49 = vor.u32 1.1754944e-38, %v834_v44  ;;  %vm833_vm3 = vcmp.eq.f32.partialorder %v832_v47, 8.507059e+37 }
 0x114   : > { %v1334_v40 = vpop.eup %1333 }
 0x115   : > { %v824_v42 = vmul.f32 %v1334_v40, %v822_v37  ;;  %vm829_vm0 = vweird.f32 %v1334_v40 }
 0x116   : > { %vm830_vm2 = vmor %vm828_vm1, %vm829_vm0 }
 0x117   : > { %v825_v43 = vsub.f32 1.0, %v824_v42 }
 0x119   : > { %v826_v46 = vmul.f32 %v1334_v40, %v825_v43 }
 0x11b   : > { %v827_v48 = vadd.f32 %v1334_v40, %v826_v46 }
 0x11d   : > { %v831_v51 = vsel %vm830_vm2, %v1334_v40, %v827_v48 }
 0x11e   : > { %v836_v52 = vsel %vm833_vm3, %v835_v49, %v831_v51 }
 0x11f   : > { %v837_v53 = vmul.f32 %v836_v52, %v812_v50 }
 0x121   : > { %v1196_v54 = vclamps-f32 %v837_v53, 1.0 }
 0x123   : > { %v840_v56 = vadd.f32 1.0, %v1196_v54 }
 0x125   : > { %v841_v57 = vmul.f32 %v840_v56, %v798_v55 }
 0x127   : > { %863 = vmatpush.msrb.mxu2 %v841_v57 }
 0x128   : > { %1197 = vmatmul.msk.f32.vlgmr.msrb.gmra.mxu2 %vm844_vm4, %v843_v58 }
 0x1ab   : > { %v865_v60 = vpop.f32.mrf.mxu2 }
 0x1ac   : > { %v868_v61 = vadd.f32 %v865_v60, %v842_v59 }
 0x1ae   : > { %869 = vst [vmem:[%s1679_s8] sm:$0x1] %v868_v61 }
 0x1af   : > { %1452 = shalt.err (!%p1449_p13)
}
 0x1b0   : > { %1259 = dma.vmem_to_hbm [thread:$0]  (%p1617_p4), %s883_s24, 16, %s885_s28, %s871_s29  }
 0x1b1 PF: > { %s1746_s14 = sld [smem:[#allocation14_spill]]  ;;  %s896_s2 = sand.u32 1, %s1495_s15  }
 0x1b2   : > { %p1273_p0 = pnand %p1000_p6, %p1625_p7  ;;  %s897_s27 = scalar_lea.sflag [#allocation4], %s896_s2 }
 0x1b4   : > { %p1274_p2 = pneg %p1273_p0 }
 0x1b6   : > { %1490 = dma.done.wait (%p1274_p2), %s897_s27, 16  }
 0x1b7   : > { %1492 = vsyncadd (%p1274_p2), %s897_s27, 4294967280  ;;  %s23_s20 = sadd.s32 1, %s1746_s14   ;;  %s1747_s17 = sld [smem:[#allocation13_spill]] }
 0x1b8   : > { %p20_p5 = scmp.ge.s32.totalorder %s23_s20, 4   ;;  %s1748_s25 = sld [smem:[#allocation16_spill]] }
 0x1b9   : > { %s1749_s10 = sld [smem:[#allocation15_spill]]  ;;  %s1750_s15 = smov %s1499_s16 }
 0x1ba   : > { %s1753_s18 = smov %s1511_s19 }
 0x1bb   :  { %22 = sbr.rel (!%p20_p5) target bundleno = 10 (0xa), region = 102 }
 0x1bd   : > { %s1751_s16 = smov %s1747_s17 }
 0x1be   : > { %s1752_s17 = smov %s1748_s25 }
 0x1bf   : > { %s1754_s19 = smov %s1749_s10 }
 0x1c0   :  { %902 = vsyncpa [#allocation3], 1 }
 0x1c1   :  { %904 = vsyncpa [#allocation3 + $0x1], 1 }
 0x1c2   :  { %905 = vsyncpa [#allocation6], 1 }
 0x1c3   :  { %907 = vsyncpa [#allocation6 + $0x1], 1 }
 0x1c4   :  { %908 = vsyncpa [#allocation4], 1 }
 0x1c5   :  { %910 = vsyncpa [#allocation4 + $0x1], 1 }

</bundles_post_ra>
